<compile_context>
chip_gen: v6e
topology: v6e:2x2x1
jax: 0.10.0
libtpu: 0.0.40
codegen_flags: <defaults>
</compile_context>

<pallas_src>
import functools

import jax
import jax.numpy as jnp
from jax import lax
from jax.experimental import pallas as pl
from jax.experimental.pallas import tpu as pltpu

# Module hyper-parameters (small, consistent with the reference module).
EMBEDDINGS = 8      # C
HEAD_SIZE = 16
DENSE_LAYER = 64    # D (per-head output width)
SEQ_LEN = 8         # T (<= block_size=120, so tril[:T,:T] is plain causal mask)
BATCH = 2
D_PAD = 128         # pad q/k/v blocks to one full lane tile


def head_kernel(x_ref, w_ref, bias_ref, o_ref, *, d_pad):
    """x_ref: (n, C) bf16; w_ref: (C, 3*d_pad) bf16 fused/pre-transposed weights
    (attention scale folded into the q block, each block zero-padded to d_pad
    lanes); bias_ref: (n, n) f32 additive mask; o_ref: (n, d_pad) f32."""
    x = x_ref[...]                                                       # (n, C)   bf16
    w = w_ref[...]                                                       # (C, 3*d_pad) bf16

    qkv = jnp.dot(x, w, preferred_element_type=jnp.float32)              # (n, 3*d_pad) f32

    # Tile-aligned (128-lane) slices; cast back to bf16 for the MXU.
    q = qkv[:, :d_pad].astype(jnp.bfloat16)                              # (n, d_pad)
    k = qkv[:, d_pad:2 * d_pad].astype(jnp.bfloat16)                     # (n, d_pad)
    v = qkv[:, 2 * d_pad:].astype(jnp.bfloat16)                          # (n, d_pad)

    # Attention scores: contract over the feature axis (no k transpose
    # materialized). Padded lanes are zero in both q and k -> no contribution.
    wei = lax.dot_general(q, k, (((1,), (1,)), ((), ())),
                          preferred_element_type=jnp.float32)            # (n, n) f32

    # Precomputed block-diagonal causal mask as a finite additive bias.
    wei = wei + bias_ref[...]

    # Numerically stable softmax (f32, exact division).
    m = jnp.max(wei, axis=-1, keepdims=True)
    e = jnp.exp(wei - m)
    s = jnp.sum(e, axis=-1, keepdims=True)
    p = e / s

    # (Dropout: identity in eval mode.)

    # Lane-dense (n, 128) output store; columns >= DENSE_LAYER are zero.
    o_ref[...] = jnp.dot(p.astype(jnp.bfloat16), v,
                         preferred_element_type=jnp.float32)


def prepare_head_params(wk, wq, wv, wdk, wdq, wdv, *, embeddings=EMBEDDINGS,
                        d_pad=D_PAD):
    """One-time weight preprocessing (hoisted out of the forward pass).

    Fuses the two projection stages exactly:
        k = (x @ wk^T) @ wdk^T = x @ (wdk @ wk)^T   (same for q, v)
    folds the C**-0.5 attention scale into the q block, zero-pads each block
    to `d_pad` output lanes, concatenates, pre-transposes to (C, 3*d_pad) and
    casts to bf16 for the MXU.
    """
    C = embeddings
    D = wdk.shape[0]
    scale = jnp.float32(C) ** jnp.float32(-0.5)

    wq_f = (wdq @ wq) * scale                     # (D, C), scale folded in
    wk_f = wdk @ wk                               # (D, C)
    wv_f = wdv @ wv                               # (D, C)

    def _pad(w):                                  # (D, C) -> (d_pad, C)
        return jnp.pad(w, ((0, d_pad - D), (0, 0)))

    w_qkv = jnp.concatenate([_pad(wq_f), _pad(wk_f), _pad(wv_f)], axis=0).T
    return w_qkv.astype(jnp.bfloat16)             # (C, 3*d_pad)


def make_mask_bias(B, T):
    """Additive mask over the flattened (B*T, B*T) score matrix:
    0 where (same batch element AND key pos <= query pos), -1e30 elsewhere."""
    n = B * T
    idx = jnp.arange(n)
    same_batch = (idx[:, None] // T) == (idx[None, :] // T)
    causal = (idx[None, :] % T) <= (idx[:, None] % T)
    keep = same_batch & causal
    return jnp.where(keep, 0.0, -1e30).astype(jnp.float32)


@functools.partial(jax.jit, static_argnames=("head_out_dim",))
def head_forward(x, w_qkv, mask_bias, head_out_dim=DENSE_LAYER):
    B, T, C = x.shape
    n = B * T
    d_pad = w_qkv.shape[1] // 3

    x2 = x.reshape(n, C).astype(jnp.bfloat16)

    out = pl.pallas_call(
        functools.partial(head_kernel, d_pad=d_pad),
        out_shape=jax.ShapeDtypeStruct((n, d_pad), jnp.float32),
        in_specs=[
            pl.BlockSpec(memory_space=pltpu.MemorySpace.VMEM),   # x (flattened, bf16)
            pl.BlockSpec(memory_space=pltpu.MemorySpace.VMEM),   # fused W_qkv (bf16)
            pl.BlockSpec(memory_space=pltpu.MemorySpace.VMEM),   # additive mask bias (f32)
        ],
        out_specs=pl.BlockSpec(memory_space=pltpu.MemorySpace.VMEM),
    )(x2, w_qkv, mask_bias)

    return out[:, :head_out_dim].reshape(B, T, head_out_dim)


def _init_linear_weight(key, out_features, in_features):
    # Deterministic init mimicking PyTorch's default U(-1/sqrt(in), 1/sqrt(in)).
    bound = 1.0 / (in_features ** 0.5)
    return jax.random.uniform(
        key, (out_features, in_features), jnp.float32, minval=-bound, maxval=bound
    )


if __name__ == "__main__":
    root = jax.random.PRNGKey(0)
    kx, k1, k2, k3, k4, k5, k6 = jax.random.split(root, 7)

    x = jax.random.normal(kx, (BATCH, SEQ_LEN, EMBEDDINGS), jnp.float32)

    wk = _init_linear_weight(k1, HEAD_SIZE, EMBEDDINGS)
    wq = _init_linear_weight(k2, HEAD_SIZE, EMBEDDINGS)
    wv = _init_linear_weight(k3, HEAD_SIZE, EMBEDDINGS)
    wdk = _init_linear_weight(k4, DENSE_LAYER, HEAD_SIZE)
    wdq = _init_linear_weight(k5, DENSE_LAYER, HEAD_SIZE)
    wdv = _init_linear_weight(k6, DENSE_LAYER, HEAD_SIZE)

    # One-time parameter preprocessing (done outside the forward pass).
    w_qkv = jax.block_until_ready(
        prepare_head_params(wk, wq, wv, wdk, wdq, wdv))
    mask_bias = jax.block_until_ready(make_mask_bias(BATCH, SEQ_LEN))

    out = head_forward(x, w_qkv, mask_bias, head_out_dim=DENSE_LAYER)
    jax.block_until_ready(out)

    assert out.shape == (BATCH, SEQ_LEN, DENSE_LAYER), out.shape
    print("KERNEL_OK")
</pallas_src>

<mosaic_0001>
module attributes {stable_mosaic.version = 11 : i64} {
  func.func @head_kernel(%arg0: memref<16x8xbf16, #tpu.memory_space<vmem>>, %arg1: memref<8x384xbf16, #tpu.memory_space<vmem>>, %arg2: memref<16x16xf32, #tpu.memory_space<vmem>>, %arg3: memref<16x128xf32, #tpu.memory_space<vmem>>) attributes {dimension_semantics = [], scalar_prefetch = 0 : i64, scratch_operands = 0 : i64, tpu.core_type = #tpu.core_type<tc>} {
    %c0 = arith.constant 0 : index
    %c0_0 = arith.constant 0 : index
    %0 = vector.load %arg0[%c0, %c0_0] : memref<16x8xbf16, #tpu.memory_space<vmem>>, vector<16x8xbf16>
    %c0_1 = arith.constant 0 : index
    %c0_2 = arith.constant 0 : index
    %1 = vector.load %arg1[%c0_1, %c0_2] : memref<8x384xbf16, #tpu.memory_space<vmem>>, vector<8x384xbf16>
    %cst = arith.constant dense<0.000000e+00> : vector<16x384xf32>
    %2 = tpu.matmul %0, %1, %cst {dimension_numbers = #tpu.dot_dimension_numbers<[1], [0], [0], [1], [0, 0, 1, 1], [], []>} : vector<16x8xbf16>, vector<8x384xbf16>, vector<16x384xf32> -> vector<16x384xf32>
    %3 = vector.extract_strided_slice %2 {offsets = [0, 0], sizes = [16, 128], strides = [1, 1]} : vector<16x384xf32> to vector<16x128xf32>
    %4 = arith.truncf %3 : vector<16x128xf32> to vector<16x128xbf16>
    %5 = vector.extract_strided_slice %2 {offsets = [0, 128], sizes = [16, 128], strides = [1, 1]} : vector<16x384xf32> to vector<16x128xf32>
    %6 = arith.truncf %5 : vector<16x128xf32> to vector<16x128xbf16>
    %7 = vector.extract_strided_slice %2 {offsets = [0, 256], sizes = [16, 128], strides = [1, 1]} : vector<16x384xf32> to vector<16x128xf32>
    %8 = arith.truncf %7 : vector<16x128xf32> to vector<16x128xbf16>
    %cst_3 = arith.constant dense<0.000000e+00> : vector<16x16xf32>
    %9 = tpu.matmul %4, %6, %cst_3 {dimension_numbers = #tpu.dot_dimension_numbers<[1], [1], [0], [0], [0, 0, 1, 0], [], []>} : vector<16x128xbf16>, vector<16x128xbf16>, vector<16x16xf32> -> vector<16x16xf32>
    %c0_4 = arith.constant 0 : index
    %c0_5 = arith.constant 0 : index
    %10 = vector.load %arg2[%c0_4, %c0_5] : memref<16x16xf32, #tpu.memory_space<vmem>>, vector<16x16xf32>
    %11 = arith.addf %9, %10 : vector<16x16xf32>
    %cst_6 = arith.constant dense<0xFF800000> : vector<16xf32>
    %12 = vector.multi_reduction <maximumf>, %11, %cst_6 [1] : vector<16x16xf32> to vector<16xf32>
    %13 = vector.shape_cast %12 : vector<16xf32> to vector<16x1xf32>
    %14 = vector.broadcast %13 : vector<16x1xf32> to vector<16x16xf32>
    %15 = arith.subf %11, %14 : vector<16x16xf32>
    %16 = math.exp %15 : vector<16x16xf32>
    %cst_7 = arith.constant dense<0.000000e+00> : vector<16xf32>
    %17 = vector.multi_reduction <add>, %16, %cst_7 [1] : vector<16x16xf32> to vector<16xf32>
    %18 = vector.shape_cast %17 : vector<16xf32> to vector<16x1xf32>
    %19 = vector.broadcast %18 : vector<16x1xf32> to vector<16x16xf32>
    %20 = arith.divf %16, %19 : vector<16x16xf32>
    %21 = arith.truncf %20 : vector<16x16xf32> to vector<16x16xbf16>
    %cst_8 = arith.constant dense<0.000000e+00> : vector<16x128xf32>
    %22 = tpu.matmul %21, %8, %cst_8 {dimension_numbers = #tpu.dot_dimension_numbers<[1], [0], [0], [1], [0, 0, 1, 1], [], []>} : vector<16x16xbf16>, vector<16x128xbf16>, vector<16x128xf32> -> vector<16x128xf32>
    %c0_9 = arith.constant 0 : index
    %c0_10 = arith.constant 0 : index
    %23 = vector.load %arg3[%c0_9, %c0_10] : memref<16x128xf32, #tpu.memory_space<vmem>>, vector<16x128xf32>
    tpu.vector_store %arg3[%c0_9, %c0_10], %22 {strides = array<i32>} : memref<16x128xf32, #tpu.memory_space<vmem>>, vector<16x128xf32>,
    return
  }
}

</mosaic_0001>

<bundles_post_ra>
// kernel: head_forward.1
= control target key start
LH: loop header
LB: loop body
LE: loop exit
PB: predicated region body
PF: predicated region fallthrough
CT: control target
= control target key end

     0   :  { %8 = vsyncpa [#allocation3], 0  ;;  %s333_s12 = smov [#allocation2]   ;;  %s388_s0 = inlined_call_operand.vmem [shape: bf16[16,8], index: 0, kind: input, shape index: {}]   ;;  %s389_s1 = inlined_call_operand.hbm [shape: bf16[8,384], index: 1, kind: input, shape index: {}]   ;;  %s390_s2 = inlined_call_operand.vmem [shape: f32[16,16], index: 2, kind: input, shape index: {}]   ;;  %s391_s3 = inlined_call_operand.vmem [shape: f32[16,128], index: 3, kind: output, shape index: {}]  }
   0x1   :  { %s17_s13 = sshll.u32 %s333_s12, 4  ;;  %s18_s13 = int_to_ptr.vmem [resolvable:$true] %s17_s13 }
   0x2   :  { %s319_s14 = scalar_lea.vmem %s18_s13, 192  ;;  %p324_p1 = scmp.lt.s32.totalorder %s18_s13, %s18_s13 }
   0x3   :  { %p320_p0 = scmp.ne.s32.totalorder %s18_s13, %s319_s14  ;;  %p325_p2 = scmp.lt.s32.totalorder %s319_s14, %s319_s14 }
   0x5   :  { %p326_p3 = por %p325_p2, %p324_p1 }
   0x7   :  { %p327_p4 = pnand %p326_p3, %p320_p0 }
   0x9   :  { %330 = shalt.err (!%p327_p4)
}
   0xa   :  { %20 = dma.hbm_to_vmem [thread:$0]  %s389_s1, 192, %s18_s13, [#allocation3]  }
   0xb   :  { %331 = dma.done.wait [#allocation3], 192  }
   0xc   :  { %332 = vsyncadd [#allocation3], 4294967104  ;;  %v334_v0 = vmov 0   ;;  %v29_v1 = vld [vmem:[#allocation2] sm:$0xff]  ;;  %vm48_vm0 = vcmask 1043456   ;;  %vm44_vm1 = vcmask 64512  }
   0xd   :  { %90 = vmatprep.mubr.bf16.mxu0 %v334_v0  ;;  %v265_v2 = vcombine.high %v29_v1, %v29_v1  ;;  %v264_v3 = vcombine.low %v29_v1, %v29_v1  ;;  %v301_v5 = vld [vmem:[%s388_s0] sm:$0xff]   ;;  %v335_v6 = vmov 0.0   ;;  %vm336_vm2 = vmmov 0   ;;  %v302_v13 = vld [vmem:[#allocation2 + $0x8] ss:$0 sps:$4 sm:$0xff]  }
   0xe   :  { %277 = vmatprep.subr.bf16.mxu1 %v335_v6  ;;  %279 = vmatprep.mubr.msk.bf16.mxu1 %vm336_vm2, %v335_v6  ;;  %v56_v14 = vsel %vm48_vm0, %v302_v13, 0  ;;  %v145_v15 = vld [vmem:[%s390_s2] sm:$0xff]  ;;  %vm188_vm3 = vcmask 130048   ;;  %v146_v19 = vld [vmem:[%s390_s2 + $0x8] sm:$0xff] }
   0xf   :  { %267 = vmatprep.subr.msk.bf16.mxu0 %vm48_vm0, %v265_v2  ;;  %v50_v4 = vsel %vm48_vm0, %v264_v3, 0  ;;  %278 = vmatpush3.bf16.msra.mxu1 %v56_v14 }
  0x10   :  { %73 = vmatpush1.bf16.msra.mxu0 %v50_v4  ;;  %289 = vmatprep.subr.bf16.mxu1 %v335_v6 }
  0x11   :  { %283 = vmatprep.subr.bf16.mxu0 %v335_v6 }
  0x12   :  { %280 = vmatmul.mubr.msk.bf16.vlgmr.msra.gmra.mxu1 %vm44_vm1, %v301_v5 }
  0x13   :  { %268 = vmatmul.mubr.msk.bf16.vlgmr.msra.gmra.mxu0 %vm44_vm1, %v301_v5  ;;  %291 = vmatprep.mubr.msk.bf16.mxu1 %vm336_vm2, %v335_v6 }
  0x14   :  { %285 = vmatprep.mubr.msk.bf16.mxu0 %vm336_vm2, %v335_v6 }
  0xd2   :  { %v135_v35 = vpop.f32.mrf.mxu1 }
  0xd3   :  { %v92_v7 = vpop.f32.mrf.mxu0 }
  0xd4   :  { %v281_v36 = vpop.f32.mrf.mxu1 }
  0xd5   :  { %v94_v8 = vpop.f32.mrf.mxu0 }
  0xd6   :  { %v138_v37 = vpop.f32.mrf.mxu1 }
  0xd7   :  { %v96_v9 = vpop.f32.mrf.mxu0  ;;  %v144_v39 = vpack.c.bf16 %v138_v37, %v135_v35 }
  0xd8   :  { %v142_v12 = vpack.c.bf16 %v96_v9, %v92_v7  ;;  %v282_v38 = vpop.f32.mrf.mxu1 }
  0xd9   :  { %v98_v10 = vpop.f32.mrf.mxu0  ;;  %290 = vmatpush3.bf16.msra.mxu1 %v144_v39 }
  0xda   :  { %v143_v11 = vpack.c.bf16 %v98_v10, %v94_v8 }
  0xdc   :  { %284 = vmatpush3.bf16.xpose.msra.mxu0 %v143_v11 }
  0xe3   :  { %286 = vmatmul.mubr.bf16.vlgmr.msra.gmra.mxu0 %v142_v12 }
 0x1a3   :  { %v181_v16 = vpop.f32.mrf.mxu0 }
 0x1a4   :  { %v182_v17 = vadd.f32 %v181_v16, %v145_v15 }
 0x1a5   :  { %v287_v18 = vpop.f32.mrf.mxu0 }
 0x1a6   :  { %v189_v20 = vsel %vm188_vm3, %v182_v17, -inf }
 0x1a7   :  { %190 = vmax.xlane.f32.xlu0 %v189_v20  ;;  %v184_v21 = vpop.f32.mrf.mxu0 }
 0x1a8   :  { %v185_v22 = vadd.f32 %v184_v21, %v146_v19 }
 0x1a9   :  { %v288_v23 = vpop.f32.mrf.mxu0 }
 0x1aa   :  { %v192_v24 = vsel %vm188_vm3, %v185_v22, -inf }
 0x1ab   :  { %193 = vmax.xlane.f32.xlu0 %v192_v24 }
 0x230   :  { %v191_v25 = vpop.xlane.xlu0 %190 }
 0x231   :  { %v195_v26 = vsub.f32 %v182_v17, %v191_v25 }
 0x233   :  { %v197_v27 = vmul.f32 1.442695, %v195_v26 }
 0x234   :  { %v194_v28 = vpop.xlane.xlu0 %193 }
 0x235   :  { %303 = vpow2.f32 %v197_v27  ;;  %v196_v29 = vsub.f32 %v185_v22, %v194_v28 }
 0x237   :  { %v199_v30 = vmul.f32 1.442695, %v196_v29 }
 0x239   :  { %305 = vpow2.f32 %v199_v30 }
 0x242   :  { %v304_v31 = vpop.eup %303 }
 0x243   :  { %v201_v32 = vsel %vm188_vm3, %v304_v31, 0.0 }
 0x244   :  { %202 = vadd.xlane.f32.xlu1 %v201_v32 }
 0x246   :  { %v306_v33 = vpop.eup %305 }
 0x247   :  { %v204_v34 = vsel %vm188_vm3, %v306_v33, 0.0 }
 0x248   :  { %205 = vadd.xlane.f32.xlu1 %v204_v34 }
 0x2cd   :  { %v203_v40 = vpop.xlane.xlu1 %202 }
 0x2ce   :  { %307 = vrcp.f32 %v203_v40 }
 0x2d1   :  { %v206_v41 = vpop.xlane.xlu1 %205 }
 0x2d2   :  { %309 = vrcp.f32 %v206_v41 }
 0x2db   :  { %v308_v42 = vpop.eup %307 }
 0x2dc   :  { %v208_v45 = vmul.f32 %v308_v42, %v304_v31 }
 0x2df   :  { %v310_v43 = vpop.eup %309 }
 0x2e0   :  { %v210_v44 = vmul.f32 %v310_v43, %v306_v33 }
 0x2e2   :  { %v211_v46 = vpack.c.bf16 %v210_v44, %v208_v45 }
 0x2e4   :  { %292 = vmatmul.mubr.msk.bf16.vlgmr.msra.gmra.mxu1 %vm188_vm3, %v211_v46 }
 0x3a4   :  { %v249_v47 = vpop.f32.mrf.mxu1 }
 0x3a5   :  { %256 = vst [vmem:[%s391_s3] sm:$0xff] %v249_v47 }
 0x3a6   :  { %v293_v48 = vpop.f32.mrf.mxu1 }
 0x3a8   :  { %v252_v49 = vpop.f32.mrf.mxu1 }
 0x3a9   :  { %257 = vst [vmem:[%s391_s3 + $0x8] sm:$0xff] %v252_v49 }
 0x3aa   :  { %v294_v50 = vpop.f32.mrf.mxu1 }
 0x3ab   :  { %262 = vsyncpa [#allocation3], 1 }

</bundles_post_ra>
